<compile_context>
chip_gen: v7x
topology: tpu7x:2x2x1
jax: 0.10.0
libtpu: 0.0.40
codegen_flags: <defaults>
</compile_context>

<pallas_src>
import functools

import jax
import jax.numpy as jnp
from jax import lax
from jax.experimental import pallas as pl
from jax.experimental.pallas import tpu as pltpu

_LANE = 128
_CHUNK = 2048        # max lanes per in-kernel reduction/scale chunk
_MAX_TM = 1024       # diminishing returns past ~1024 rows per grid step


def _sublane_multiple(itemsize: int) -> int:
    """Packed sublane count: 8 for f32, 16 for bf16, 32 for int8/fp8."""
    return max(8, 32 // max(1, itemsize))


def _vmem_capacity_bytes() -> int:
    try:
        info = pltpu.get_tpu_info()
        for attr in ("vmem_capacity_bytes", "vmem_size_bytes", "vmem_bytes"):
            v = getattr(info, attr, None)
            if v:
                return int(v)
    except Exception:
        pass
    return 64 << 20  # conservative default: v7x per-TC VMEM


def _vmem_budgets() -> tuple[int, int]:
    """(kernel buffer budget, scoped vmem_limit_bytes) per TPU generation."""
    cap = _vmem_capacity_bytes()
    if cap <= (64 << 20):           # v7x-class: 64 MiB per TensorCore
        return 20 << 20, 32 << 20
    return 40 << 20, 64 << 20       # v5e / v6e: 128 MiB physical VMEM


def _choose_tm(n: int, d_pad: int, itemsize: int, chunk: int, budget: int) -> int:
    """Largest sublane-aligned row tile that fits the VMEM budget and keeps
    the grid multi-step."""
    sub = _sublane_multiple(itemsize)
    if n <= sub:
        return n  # full-extent block on the row dim is always legal

    # VMEM accounting:
    #  * 2x double-buffered DMA tiles for input and output, native dtype
    #  * live f32 chunk intermediates (~3 copies of a (tm, chunk) f32 slab)
    bytes_per_row = 4 * d_pad * itemsize + 3 * chunk * 4
    tm = max(sub, budget // bytes_per_row)
    tm = min(tm, _MAX_TM, n)

    # Guarantee >= 2 grid steps (prefer >= 8) so the in-DMA -> compute ->
    # out-DMA pipeline overlaps and v7x's 2 TensorCores both get work.
    if n >= 2 * sub:
        pref_steps = 8 if n >= 8 * sub else 2
        cap = max(sub, ((n // pref_steps) // sub) * sub)
        tm = min(tm, cap)

    tm = max(sub, (tm // sub) * sub)  # packed-sublane aligned
    return tm


def _normalize_kernel(x_ref, o_ref, acc_ref, *, power: int, chunks, scale_native: bool):
    """Lp-normalize each row of a (tm, D_pad) tile: out = x / sum(x**p)**(1/p)."""
    # ---- Pass 1: per-row sum of x**p, chunked over the lane axis so the live
    # f32 temporaries stay bounded at (tm, chunk) regardless of D.
    acc_ref[...] = jnp.zeros_like(acc_ref)
    for off, size in chunks:
        xf = x_ref[:, pl.ds(off, size)].astype(jnp.float32)
        xp = xf
        for _ in range(power - 1):          # x**p via VPU multiplies, no EUP pow
            xp = xp * xf
        acc_ref[...] += jnp.sum(xp, axis=-1, keepdims=True)

    # ---- inv_norm = sum**(-1/p), only (tm, 1) values on the special-fn path.
    s = acc_ref[...]
    if power == 1:
        inv = pl.reciprocal(s)
    elif power == 2:
        inv = lax.rsqrt(s)
    elif power == 4:
        inv = lax.rsqrt(jnp.sqrt(s))
    else:
        inv = jnp.power(s, jnp.float32(-1.0 / power))

    # ---- Pass 2: broadcast-multiply each chunk by 1/norm (no divide).
    inv_n = inv.astype(o_ref.dtype) if scale_native else inv
    for off, size in chunks:
        xc = x_ref[:, pl.ds(off, size)]
        if scale_native:
            # Native bf16 multiply: half the vreg/VMEM footprint on v6e/v7x.
            o_ref[:, pl.ds(off, size)] = xc * inv_n
        else:
            o_ref[:, pl.ds(off, size)] = (xc.astype(jnp.float32) * inv_n).astype(o_ref.dtype)


def normalize(x: jax.Array, power: int = 2) -> jax.Array:
    """x / (sum_d x**power)**(1/power), broadcast over the feature dim."""
    power = int(power)
    assert power >= 1
    assert x.ndim == 2, "Normalize kernel expects a (rows, features) matrix"
    N, D = x.shape
    itemsize = x.dtype.itemsize

    # Lane-dense feature dim: zero-pad D to a multiple of 128 (zeros contribute
    # nothing to sum(x**p)); padding is sliced off after the kernel.
    D_pad = max(_LANE, ((D + _LANE - 1) // _LANE) * _LANE)
    x_in = x if D_pad == D else jnp.pad(x, ((0, 0), (0, D_pad - D)))

    chunk = min(D_pad, _CHUNK)
    chunks = tuple((off, min(chunk, D_pad - off)) for off in range(0, D_pad, chunk))

    budget, vmem_limit = _vmem_budgets()
    tm = _choose_tm(N, D_pad, itemsize, chunk, budget)
    grid = (pl.cdiv(N, tm),)

    scale_native = x.dtype == jnp.dtype(jnp.bfloat16)

    kernel = functools.partial(
        _normalize_kernel, power=power, chunks=chunks, scale_native=scale_native)

    cost = pl.CostEstimate(
        flops=(power + 1) * N * D_pad,
        transcendentals=N,
        bytes_accessed=2 * N * D_pad * itemsize,
    )

    out = pl.pallas_call(
        kernel,
        out_shape=jax.ShapeDtypeStruct((N, D_pad), x.dtype),
        grid_spec=pltpu.PrefetchScalarGridSpec(
            num_scalar_prefetch=0,
            grid=grid,
            in_specs=[pl.BlockSpec((tm, D_pad), lambda i: (i, 0))],
            out_specs=pl.BlockSpec((tm, D_pad), lambda i: (i, 0)),
            scratch_shapes=[pltpu.VMEM((tm, 1), jnp.float32)],
        ),
        compiler_params=pltpu.CompilerParams(
            dimension_semantics=("parallel",),
            vmem_limit_bytes=vmem_limit,
        ),
        cost_estimate=cost,
    )(x_in)

    return out if D_pad == D else out[:, :D]


if __name__ == "__main__":
    key = jax.random.PRNGKey(0)
    k1, k2, k3 = jax.random.split(key, 3)

    # p = 2 (module default), f32, multi-step grid.
    x1 = jax.random.normal(k1, (64, 128), dtype=jnp.float32)
    out1 = jax.block_until_ready(normalize(x1, power=2))
    norm1 = jnp.power(jnp.sum(jnp.power(x1, 2), axis=1, keepdims=True), 1.0 / 2.0)
    assert jnp.allclose(out1, x1 / norm1, atol=1e-5, rtol=1e-5)

    # p = 3, positive inputs (matches the module: sum(x**p), no abs).  Odd N and
    # a feature dim that is not a multiple of 128 (exercises lane padding and
    # the partial trailing row block).
    x2 = jnp.abs(jax.random.normal(k2, (10, 96), dtype=jnp.float32)) + 0.1
    out2 = jax.block_until_ready(normalize(x2, power=3))
    norm2 = jnp.power(jnp.sum(jnp.power(x2, 3), axis=1, keepdims=True), 1.0 / 3.0)
    assert jnp.allclose(out2, x2 / norm2, atol=1e-5, rtol=1e-5)

    # bf16 path (f32 reduction, native bf16 scale multiply).
    x3 = jax.random.normal(k3, (32, 256), dtype=jnp.bfloat16)
    out3 = jax.block_until_ready(normalize(x3, power=2))
    x3f = x3.astype(jnp.float32)
    ref3 = x3f / jnp.sqrt(jnp.sum(x3f * x3f, axis=1, keepdims=True))
    assert jnp.allclose(out3.astype(jnp.float32), ref3, atol=3e-2, rtol=3e-2)

    print("KERNEL_OK")
</pallas_src>

<mosaic_0001>
module attributes {stable_mosaic.version = 11 : i64} {
  func.func @_normalize_kernel(%arg0: i32, %arg1: memref<8x128xf32, #tpu.memory_space<vmem>>, %arg2: memref<8x128xf32, #tpu.memory_space<vmem>>, %arg3: memref<8x1xf32, #tpu.memory_space<vmem>>) attributes {dimension_semantics = [#tpu.dimension_semantics<parallel>], iteration_bounds = array<i64: 8>, scalar_prefetch = 0 : i64, scratch_operands = 1 : i64, tpu.core_type = #tpu.core_type<tc>, window_params = [{transform_indices = @transform_0, window_bounds = array<i64: 8, 128>}, {transform_indices = @transform_1, window_bounds = array<i64: 8, 128>}]} {
    %cst = arith.constant 0.000000e+00 : f32
    %0 = vector.broadcast %cst : f32 to vector<8x1xf32>
    %c0 = arith.constant 0 : index
    %c0_0 = arith.constant 0 : index
    %1 = vector.load %arg3[%c0, %c0_0] : memref<8x1xf32, #tpu.memory_space<vmem>>, vector<8x1xf32>
    tpu.vector_store %arg3[%c0, %c0_0], %0 {strides = array<i32>} : memref<8x1xf32, #tpu.memory_space<vmem>>, vector<8x1xf32>,
    %c0_1 = arith.constant 0 : index
    %c0_2 = arith.constant 0 : index
    %2 = vector.load %arg1[%c0_1, %c0_2] : memref<8x128xf32, #tpu.memory_space<vmem>>, vector<8x128xf32>
    %3 = arith.mulf %2, %2 : vector<8x128xf32>
    %c0_3 = arith.constant 0 : index
    %c0_4 = arith.constant 0 : index
    %4 = vector.load %arg3[%c0_3, %c0_4] : memref<8x1xf32, #tpu.memory_space<vmem>>, vector<8x1xf32>
    %cst_5 = arith.constant dense<0.000000e+00> : vector<8xf32>
    %5 = vector.multi_reduction <add>, %3, %cst_5 [1] : vector<8x128xf32> to vector<8xf32>
    %6 = vector.shape_cast %5 : vector<8xf32> to vector<8x1xf32>
    %7 = arith.addf %4, %6 : vector<8x1xf32>
    %c0_6 = arith.constant 0 : index
    %c0_7 = arith.constant 0 : index
    %8 = vector.load %arg3[%c0_6, %c0_7] : memref<8x1xf32, #tpu.memory_space<vmem>>, vector<8x1xf32>
    tpu.vector_store %arg3[%c0_6, %c0_7], %7 {strides = array<i32>} : memref<8x1xf32, #tpu.memory_space<vmem>>, vector<8x1xf32>,
    %c0_8 = arith.constant 0 : index
    %c0_9 = arith.constant 0 : index
    %9 = vector.load %arg3[%c0_8, %c0_9] : memref<8x1xf32, #tpu.memory_space<vmem>>, vector<8x1xf32>
    %10 = math.rsqrt %9 : vector<8x1xf32>
    %c0_10 = arith.constant 0 : index
    %c0_11 = arith.constant 0 : index
    %11 = vector.load %arg1[%c0_10, %c0_11] : memref<8x128xf32, #tpu.memory_space<vmem>>, vector<8x128xf32>
    %12 = vector.broadcast %10 : vector<8x1xf32> to vector<8x128xf32>
    %13 = arith.mulf %11, %12 : vector<8x128xf32>
    %c0_12 = arith.constant 0 : index
    %c0_13 = arith.constant 0 : index
    %14 = vector.load %arg2[%c0_12, %c0_13] : memref<8x128xf32, #tpu.memory_space<vmem>>, vector<8x128xf32>
    tpu.vector_store %arg2[%c0_12, %c0_13], %13 {strides = array<i32>} : memref<8x128xf32, #tpu.memory_space<vmem>>, vector<8x128xf32>,
    return
  }
  func.func @transform_0(%arg0: i32) -> (i32, i32) {
    %c0_i32 = arith.constant 0 : i32
    %c0_i32_0 = arith.constant 0 : i32
    return %arg0, %c0_i32 : i32, i32
  }
  func.func @transform_1(%arg0: i32) -> (i32, i32) {
    %c0_i32 = arith.constant 0 : i32
    %c0_i32_0 = arith.constant 0 : i32
    return %arg0, %c0_i32 : i32, i32
  }
}

</mosaic_0001>

<bundles_post_ra>
// kernel: tpu_custom_call.1
= control target key start
LH: loop header
LB: loop body
LE: loop exit
PB: predicated region body
PF: predicated region fallthrough
CT: control target
= control target key end

     0   :  { %6 = vsyncpa [#allocation4], 0  ;;  %s569_s0 = inlined_call_operand.hbm [shape: f32[64,128], index: 0, kind: input, shape index: {}]   ;;  %s570_s1 = inlined_call_operand.hbm [shape: f32[64,128], index: 1, kind: output, shape index: {}]  }
   0x1   :  { %8 = vsyncpa [#allocation4 + $0x1], 0 }
   0x2   :  { %9 = vsyncpa [#allocation5], 0 }
   0x3   :  { %11 = vsyncpa [#allocation5 + $0x1], 0  ;;  %s410_s6 = smov 0   ;;  %s412_s7 = smov 0  }
   0x4   :  { %s414_s8 = smov 0   ;;  %s416_s9 = smov 0  }
   0x5 LB: > { %s431_s10 = sadd.s32 4294967295, %s394_s9   ;;  %s235_s11 = sadd.s32 4294967294, %s394_s9   ;;  %s394_s9 = sphi %s416_s9, %s584_s9   ;;  %s390_s8 = sphi %s414_s8, %s583_s8   ;;  %s386_s7 = sphi %s412_s7, %s582_s7   ;;  %s382_s6 = sphi %s410_s6, %s581_s6  }
   0x6   : > { %s435_s12 = sadd.s32 1, %s394_s9   ;;  %s24_s13 = sadd.s32 1, %s390_s8 }
   0x7   : > { %s21_s14 = ssub.s32 %s394_s9, %s435_s12  ;;  %p31_p0 = scmp.ne.s32.totalorder %s390_s8, %s386_s7 }
   0x8   : > { %p22_p1 = scmp.eq.s32.totalorder %s21_s14, 0  ;;  %p32_p2 = scmp.eq.s32.totalorder %s394_s9, 0 }
   0x9   : > { %p37_p3 = scmp.ne.s32.totalorder %s386_s7, %s382_s6  ;;  %p38_p4 = scmp.eq.s32.totalorder %s431_s10, 0 }
   0xa   : > { %s447_s15 = scalar_select %p22_p1, %s390_s8, %s24_s13  }
   0xb   : > { %p449_p5 = por %p32_p2, %p31_p0  ;;  %p453_p6 = por %p38_p4, %p37_p3 }
   0xc   : > { %p61_p7 = scmp.eq.s32.totalorder %s431_s10, 7  ;;  %p67_p8 = scmp.eq.s32.totalorder %s235_s11, 7 }
   0xd   : > { %p259_p9 = scmp.lt.s32.totalorder %s394_s9, 8  ;;  %s87_s20 = sand.u32 1, %s390_s8  }
   0xe   : > { %p459_p10 = por %p61_p7, %p31_p0  ;;  %p463_p11 = por %p67_p8, %p37_p3 }
   0xf   : > { %s239_s21 = sshll.u32 %s394_s9, 7  ;;  %s238_s22 = sshll.u32 %s87_s20, 3 }
  0x10   : > { %s574_s18 = scalar_select %p459_p10, 1, 0 }
  0x11   : > { %s575_s19 = scalar_select %p463_p11, 1, 0 }
  0x12   : > { %s472_s25 = scalar_lea.hbm %s569_s0, %s239_s21  ;;  %s91_s26 = scalar_lea.vmem [#allocation3], %s238_s22 }
  0x13   : > { %s98_s27 = sshll.u32 %s91_s26, 4  ;;  %p476_p12 = pnand %p259_p9, %p449_p5  ;;  %s480_s27 = int_to_ptr.vmem [resolvable:$true] %s98_s27 }
  0x14   : > { %s88_s29 = scalar_lea.sflag [#allocation4], %s87_s20  ;;  %s298_s30 = scalar_lea.hbm %s472_s25, 128 }
  0x15   : > { %p299_p1 = scmp.ne.s32.totalorder %s472_s25, %s298_s30  ;;  %p300_p2 = pneg %p476_p12 }
  0x16   : > { %s303_s4 = scalar_lea.hbm %s569_s0, 1024  ;;  %p304_p5 = scmp.lt.u32.totalorder %s472_s25, %s569_s0 }
  0x17   : > { %p301_p3 = pnand %p300_p2, %p299_p1  ;;  %p305_p7 = scmp.lt.u32.totalorder %s303_s4, %s298_s30 }
  0x18   : > { %p307_p9 = scmp.lt.u32.totalorder %s298_s30, %s472_s25 }
  0x19   : > { %p302_p4 = pneg %p301_p3  ;;  %p306_p8 = por %p305_p7, %p304_p5 }
  0x1b   : > { %p308_p13 = por %p307_p9, %p306_p8 }
  0x1d   : > { %p309_p0 = pnand %p308_p13, %p302_p4 }
  0x1f   : > { %312 = shalt.err (!%p309_p0)
}
  0x20   : > { %s313_s13 = scalar_lea.vmem %s480_s27, 128  ;;  %s396_s14 = smov [#allocation3]  }
  0x21   : > { %p314_p1 = scmp.ne.s32.totalorder %s480_s27, %s313_s13  ;;  %s318_s16 = sshll.u32 %s396_s14, 4  ;;  %s319_s16 = int_to_ptr.vmem [resolvable:$false] %s318_s16 }
  0x22   : > { %s320_s20 = scalar_lea.vmem %s319_s16, 256  ;;  %p321_p10 = scmp.lt.s32.totalorder %s480_s27, %s319_s16 }
  0x23   : > { %p316_p3 = pnand %p314_p1, %p300_p2  ;;  %p322_p5 = scmp.lt.s32.totalorder %s320_s20, %s313_s13 }
  0x25   : > { %p317_p11 = pneg %p316_p3  ;;  %p323_p7 = por %p322_p5, %p321_p10 }
  0x27   : > { %p324_p8 = pnand %p323_p7, %p317_p11 }
  0x29   : > { %327 = shalt.err (!%p324_p8)
}
  0x2a   : > { %254 = dma.hbm_to_vmem [thread:$0]  (!%p476_p12), %s472_s25, 128, %s480_s27, %s88_s29  }
  0x2b   : > { %p577_p13 = scmp.lt.s32.totalorder %s394_s9, 9  ;;  %p578_p0 = scmp.ge.s32.totalorder %s394_s9, 1 }
  0x2d   : > { %p104_p2 = pnand %p578_p0, %p577_p13 }
  0x2e   : > { %s514_s21 = sand.u32 (!%p104_p2), 1, %s386_s7  }
  0x2f   : > { %107 = sbr.rel (%p104_p2) target bundleno = 365 (0x16d), region = 24  ;;  %s241_s22 = sshll.u32 (!%p104_p2), %s514_s21, 3 }
  0x30   : > { %s110_s23 = scalar_lea.sflag (!%p104_p2), [#allocation4], %s514_s21  ;;  %s113_s24 = scalar_lea.vmem (!%p104_p2), [#allocation3], %s241_s22 }
  0x36   : > { %373 = dma.done.wait (%p453_p6), %s110_s23, 128  }
  0x37   : > { %375 = vsyncadd (%p453_p6), %s110_s23, 4294967168  ;;  %vm132_vm0 = vcmask 7168   ;;  %v397_v0 = vmov 0.0   ;;  %v134_v1 = vld [vmem:[%s113_s24] sm:$0xff]  ;;  %v398_v3 = vmov 0   ;;  %s244_s17 = sshll.u32 %s431_s10, 7 }
  0x38   : > { %133 = vst.msk [vmem:[#allocation2] sm:$0xff] %vm132_vm0, %v397_v0  ;;  %v135_v2 = vmul.f32 %v134_v1, %v134_v1  ;;  %295 = vset.pattern.permute.xlu0 %v398_v3  ;;  %s131_s25 = scalar_lea.vmem [#allocation6], %s241_s22  ;;  %s526_s29 = scalar_lea.hbm %s570_s1, %s244_s17 }
  0x39   : > { %s165_s26 = sshll.u32 %s131_s25, 4  ;;  %s152_s30 = scalar_lea.sflag [#allocation5], %s514_s21  ;;  %s528_s26 = int_to_ptr.vmem [resolvable:$true] %s165_s26 }
  0x3a   : > { %137 = vadd.xlane.f32.xlu0 %v135_v2  ;;  %s328_s2 = scalar_lea.vmem %s528_s26, 128  ;;  %p579_p10 = scmp.ne.s32.totalorder %s574_s18, 0 }
  0x3b   : > { %p329_p6 = scmp.ne.s32.totalorder %s528_s26, %s328_s2  ;;  %s399_s10 = smov [#allocation6]  }
  0x3c   : > { %s332_s3 = sshll.u32 %s399_s10, 4  ;;  %s333_s3 = int_to_ptr.vmem [resolvable:$false] %s332_s3 }
  0x3d   : > { %p330_p11 = pnand %p329_p6, %p579_p10  ;;  %s334_s4 = scalar_lea.vmem %s333_s3, 256 }
  0x3e   : > { %p335_p4 = scmp.lt.s32.totalorder %s528_s26, %s333_s3  ;;  %p336_p9 = scmp.lt.s32.totalorder %s334_s4, %s328_s2 }
  0x3f   : > { %v136_v4 = vld [vmem:[#allocation2] sm:$0xff]  ;;  %p331_p12 = pneg %p330_p11 }
  0x40   : > { %p337_p1 = por %p336_p9, %p335_p4 }
  0x42   : > { %p338_p3 = pnand %p337_p1, %p331_p12 }
  0xc7   : > { %v138_v5 = vpop.xlane.xlu0 %137 }
  0xc8   : > { %v139_v6 = vadd.f32 %v138_v5, %v136_v4 }
  0xca   : > { %140 = vst.msk [vmem:[#allocation2] sm:$0xff] %vm132_vm0, %v139_v6 }
  0xd1   : > { %v141_v7 = vld [vmem:[#allocation2] sm:$0xff] }
  0xd2   : > { %296 = vrsqrt.f32 %v141_v7 }
  0xdc   : > { %v297_v8 = vpop.eup %296 }
  0xdd   : > { %146 = vperm.xlu0 %295, %v297_v8  }
 0x15c   : > { %v147_v9 = vpop.permute.xlu0 %146 }
 0x15d   : > { %v149_v10 = vmul.f32 %v147_v9, %v134_v1 }
 0x15f   : > { %150 = vst [vmem:[%s131_s25] sm:$0xff] %v149_v10 }
 0x160   : > { %341 = shalt.err (!%p338_p3)
}
 0x161   : > { %s342_s5 = scalar_lea.hbm %s526_s29, 128  ;;  %s346_s14 = scalar_lea.hbm %s570_s1, 1024 }
 0x162   : > { %p343_p5 = scmp.ne.s32.totalorder %s526_s29, %s342_s5  ;;  %p347_p13 = scmp.lt.u32.totalorder %s526_s29, %s570_s1 }
 0x163   : > { %p348_p0 = scmp.lt.u32.totalorder %s346_s14, %s342_s5  ;;  %p350_p6 = scmp.lt.u32.totalorder %s342_s5, %s526_s29 }
 0x164   : > { %p344_p7 = pnand %p343_p5, %p579_p10 }
 0x165   : > { %p349_p2 = por %p348_p0, %p347_p13 }
 0x166   : > { %p345_p8 = pneg %p344_p7 }
 0x167   : > { %p351_p11 = por %p350_p6, %p349_p2 }
 0x169   : > { %p352_p12 = pnand %p351_p11, %p345_p8 }
 0x16b   : > { %355 = shalt.err (!%p352_p12)
}
 0x16c   : > { %249 = dma.vmem_to_hbm [thread:$0]  (%p579_p10), %s528_s26, 128, %s526_s29, %s152_s30  }
 0x16d PF: > { %p260_p4 = scmp.ge.s32.totalorder %s394_s9, 2  ;;  %s177_s21 = sand.u32 1, %s382_s6  }
 0x16e   : > { %p580_p9 = scmp.ne.s32.totalorder %s575_s19, 0  ;;  %s178_s22 = scalar_lea.sflag [#allocation5], %s177_s21 }
 0x170   : > { %p256_p1 = pnand %p260_p4, %p580_p9 }
 0x172   : > { %377 = dma.done.wait (!%p256_p1), %s178_s22, 128  }
 0x173   : > { %379 = vsyncadd (!%p256_p1), %s178_s22, 4294967168  ;;  %p14_p3 = scmp.ge.s32.totalorder %s435_s12, 10   ;;  %s581_s6 = smov %s386_s7 }
 0x174   : > { %s582_s7 = smov %s390_s8  ;;  %s583_s8 = smov %s447_s15 }
 0x175   : > { %s584_s9 = smov %s435_s12  ;;  %16 = sbr.rel (!%p14_p3) target bundleno = 5 (0x5), region = 69 }
 0x17c   :  { %183 = vsyncpa [#allocation4], 1 }
 0x17d   :  { %185 = vsyncpa [#allocation4 + $0x1], 1 }
 0x17e   :  { %186 = vsyncpa [#allocation5], 1 }
 0x17f   :  { %188 = vsyncpa [#allocation5 + $0x1], 1 }

</bundles_post_ra>
